<compile_context>
chip_gen: v7x
topology: tpu7x:2x2x1
jax: 0.10.0
libtpu: 0.0.40
codegen_flags: <defaults>
</compile_context>

<pallas_src>
import random
import numpy as np
import jax
import jax.numpy as jnp
from jax.experimental import pallas as pl
from jax.experimental.pallas import tpu as pltpu

LANE = 128      # vreg lane width: last (lane) dims padded to this
SUBLANE = 16    # bf16 sublane pack: batch/sublane dims only need this much


def _round_up(x, m):
    return ((x + m - 1) // m) * m


def _pick_tile(padded, preferred, quantum):
    """Largest tile <= preferred (multiple of quantum) that divides `padded`."""
    t = min(preferred, padded)
    t = max(quantum, (t // quantum) * quantum)
    while padded % t:
        t -= quantum
    return t


# ---------------------------------------------------------------------------
# Kernel 1: MLP on the unique-neighbor embeddings, h = relu(embed @ W + b).
# Depends only on the U axis -> computed once per U tile (never per N tile).
# ---------------------------------------------------------------------------
def mlp_kernel(emb_ref, w_ref, b_ref, h_ref):
    # bf16 operands -> full-rate MXU, f32 accumulation.
    acc = jnp.dot(emb_ref[...], w_ref[...], preferred_element_type=jnp.float32)
    # Bias + ReLU epilogue kept in f32 (v5e has no bf16 VPU); cast on store.
    h_ref[...] = jnp.maximum(acc + b_ref[...], 0.0).astype(h_ref.dtype)


# ---------------------------------------------------------------------------
# Kernel 2: mean pooling  out = (mask @ h) * inv_count
# Grid over N tiles only; h is one VMEM-resident block (index_map ignores i),
# so each N tile does a single full-K matmul straight into out_ref -- no
# reduction axis, no accumulator scratch, no init/finalize pl.when.
# ---------------------------------------------------------------------------
def pool_kernel(mask_ref, h_ref, inv_ref, out_ref):
    # mask is exact 0/1 in bf16; both matmul operands bf16, f32 accumulate.
    acc = jnp.dot(mask_ref[...], h_ref[...], preferred_element_type=jnp.float32)
    # Exact f32 inverse counts precomputed host-side (padded rows hold 0).
    out_ref[...] = (acc * inv_ref[...]).astype(out_ref.dtype)


def pool_aggregator_forward(mask, embed, w, b, inv_counts, *, tn=256, tu=512):
    """mask (N,U) 0/1, embed (U,Din), w (Din,H), b (1,H), inv_counts (N,1)."""
    N, U = mask.shape
    Din, H = w.shape

    # Only lane dims need 128; batch/sublane dims need 16 (bf16) at most.
    n_pad = _round_up(N, SUBLANE)
    u_pad = _round_up(U, LANE)
    d_pad = _round_up(Din, LANE)
    h_pad = _round_up(H, LANE)

    tn_eff = _pick_tile(n_pad, tn, SUBLANE)
    tu_eff = _pick_tile(u_pad, tu, LANE)

    # Zero-pad to MXU/lane-friendly shapes. Padded mask rows/cols and padded
    # inverse counts are zero, so padded embedding rows and padded batch rows
    # never contribute to (or pollute) the sliced-out result.
    mask_p = jnp.zeros((n_pad, u_pad), jnp.bfloat16).at[:N, :U].set(
        mask.astype(jnp.bfloat16))
    emb_p = jnp.zeros((u_pad, d_pad), jnp.bfloat16).at[:U, :Din].set(
        embed.astype(jnp.bfloat16))
    w_p = jnp.zeros((d_pad, h_pad), jnp.bfloat16).at[:Din, :H].set(
        w.astype(jnp.bfloat16))
    b_p = jnp.zeros((1, h_pad), jnp.float32).at[:, :H].set(
        b.astype(jnp.float32))
    inv_p = jnp.zeros((n_pad, 1), jnp.float32).at[:N, :].set(
        inv_counts.astype(jnp.float32))

    # --- kernel 1: MLP over unique-neighbor embeddings ----------------------
    # TODO(synk): for Din >> 128 add a K-reduction grid axis (and tile K/N in
    # 256s on v6e/v7x); at these sizes one (d_pad, h_pad) block trivially fits.
    h_mat = pl.pallas_call(
        mlp_kernel,
        out_shape=jax.ShapeDtypeStruct((u_pad, h_pad), jnp.bfloat16),
        grid_spec=pltpu.PrefetchScalarGridSpec(
            num_scalar_prefetch=0,
            grid=(u_pad // tu_eff,),
            in_specs=[
                pl.BlockSpec((tu_eff, d_pad), lambda u: (u, 0)),
                pl.BlockSpec((d_pad, h_pad), lambda u: (0, 0)),
                pl.BlockSpec((1, h_pad), lambda u: (0, 0)),
            ],
            out_specs=pl.BlockSpec((tu_eff, h_pad), lambda u: (u, 0)),
        ),
        compiler_params=pltpu.CompilerParams(
            dimension_semantics=("parallel",)),
    )(emb_p, w_p, b_p)

    # --- kernel 2: mean pooling (mask @ h) * inv_count -----------------------
    # TODO(synk): for production graph sizes (large U) replace this dense
    # mask @ h with a scalar-prefetch gather/segment-sum kernel (<= num_sample
    # nonzeros per row), and hold h via manual DMA instead of one block.
    out_p = pl.pallas_call(
        pool_kernel,
        out_shape=jax.ShapeDtypeStruct((n_pad, h_pad), jnp.float32),
        grid_spec=pltpu.PrefetchScalarGridSpec(
            num_scalar_prefetch=0,
            grid=(n_pad // tn_eff,),                               # N tiles only
            in_specs=[
                pl.BlockSpec((tn_eff, u_pad), lambda i: (i, 0)),   # mask tile
                pl.BlockSpec((u_pad, h_pad), lambda i: (0, 0)),    # h, resident
                pl.BlockSpec((tn_eff, 1), lambda i: (i, 0)),       # 1/count
            ],
            out_specs=pl.BlockSpec((tn_eff, h_pad), lambda i: (i, 0)),
        ),
        compiler_params=pltpu.CompilerParams(
            dimension_semantics=("parallel",)),
    )(mask_p, h_mat, inv_p)

    return out_p[:N, :H]


# ----------------------------------------------------------------------------
# Host-side graph preprocessing (mirrors the Python/set logic of the module).
# No Pallas equivalent: random.sample, set.union, dict building.
# ----------------------------------------------------------------------------
def build_mask_and_unique(to_neighs, num_sample, pad_unique, seed=0):
    rng = random.Random(seed)
    samp_neighs = [
        set(rng.sample(sorted(tn), num_sample)) if len(tn) >= num_sample else set(tn)
        for tn in to_neighs
    ]
    unique_nodes_list = sorted(set.union(*samp_neighs))
    unique_nodes = {n: i for i, n in enumerate(unique_nodes_list)}
    assert len(unique_nodes_list) <= pad_unique, "pad_unique too small"

    mask = np.zeros((len(samp_neighs), pad_unique), dtype=np.float32)
    for i, sn in enumerate(samp_neighs):
        for n in sn:
            mask[i, unique_nodes[n]] = 1.0
    # Exact f32 inverse neighbor counts, precomputed host-side (no in-kernel
    # XLU rowsum, no approx reciprocal, zero-neighbor rows guarded here).
    inv_counts = (1.0 / np.maximum(mask.sum(axis=1, keepdims=True), 1.0)
                  ).astype(np.float32)

    # Pad unique-node list to a static size; padded columns carry zero mask
    # weight so the gathered (arbitrary) rows never contribute to the output.
    uniq_padded = np.array(
        unique_nodes_list + [0] * (pad_unique - len(unique_nodes_list)),
        dtype=np.int32)
    return mask, inv_counts, uniq_padded


if __name__ == "__main__":
    # Small synthetic graph consistent with the module's forward.
    V = 64           # total nodes in the graph
    Din = 32         # input_dim
    H = 32           # hidden_dim
    N = 8            # batch of nodes
    num_sample = 10
    PAD_UNIQUE = 256  # u_pad = 256 -> single resident h block in kernel 2

    key = jax.random.PRNGKey(0)
    kf, kw, kb = jax.random.split(key, 3)

    # features(ids) is a lookup table here; nn.Linear-style deterministic init.
    features_table = jax.random.normal(kf, (V, Din), dtype=jnp.float32)
    bound = 1.0 / float(np.sqrt(Din))
    W = jax.random.uniform(kw, (Din, H), jnp.float32, minval=-bound, maxval=bound)
    b = jax.random.uniform(kb, (1, H), jnp.float32, minval=-bound, maxval=bound)

    # Deterministic random neighbor sets (gcn=False path: no self-loop added).
    rng = random.Random(0)
    to_neighs = [set(rng.sample(range(V), rng.randint(3, 15))) for _ in range(N)]

    mask_np, inv_counts_np, uniq = build_mask_and_unique(
        to_neighs, num_sample, pad_unique=PAD_UNIQUE, seed=0)
    mask = jnp.asarray(mask_np)              # (N, PAD_UNIQUE) 0/1
    inv_counts = jnp.asarray(inv_counts_np)  # (N, 1) exact f32 1/count
    # TODO(synk): fuse this gather into the MLP kernel via scalar-prefetched
    # row indices (PrefetchScalarGridSpec / manual DMA gather) to avoid the
    # (U, Din) HBM round trip for large U.
    embed = features_table[jnp.asarray(uniq)]   # (PAD_UNIQUE, Din)

    out = pool_aggregator_forward(mask, embed, W, b, inv_counts)
    out = jax.block_until_ready(out)

    # Pure-JAX f32 reference of the same forward (MLP + mean pool).
    h_ref = jnp.maximum(embed @ W + b, 0.0)
    denom = jnp.maximum(jnp.sum(mask, axis=1, keepdims=True), 1.0)
    ref = (mask @ h_ref) / denom
    # Intentional precision loss: embed/W/mask and the intermediate h are bf16
    # (MXU operands); counts are applied as exact f32 inverses post-matmul.
    np.testing.assert_allclose(np.asarray(out), np.asarray(ref),
                               rtol=2e-2, atol=2e-2)

    print("KERNEL_OK")
</pallas_src>

<mosaic_0001>
module attributes {stable_mosaic.version = 11 : i64} {
  func.func @mlp_kernel(%arg0: i32, %arg1: memref<256x128xbf16, #tpu.memory_space<vmem>>, %arg2: memref<128x128xbf16, #tpu.memory_space<vmem>>, %arg3: memref<1x128xf32, #tpu.memory_space<vmem>>, %arg4: memref<256x128xbf16, #tpu.memory_space<vmem>>) attributes {dimension_semantics = [#tpu.dimension_semantics<parallel>], iteration_bounds = array<i64: 1>, scalar_prefetch = 0 : i64, scratch_operands = 0 : i64, tpu.core_type = #tpu.core_type<tc>, window_params = [{transform_indices = @transform_0, window_bounds = array<i64: 256, 128>}, {pipeline_mode = #tpu.pipeline_mode<synchronous>, transform_indices = @transform_1, window_bounds = array<i64: 128, 128>}, {pipeline_mode = #tpu.pipeline_mode<synchronous>, transform_indices = @transform_2, window_bounds = array<i64: 1, 128>}, {transform_indices = @transform_3, window_bounds = array<i64: 256, 128>}]} {
    %c0 = arith.constant 0 : index
    %c0_0 = arith.constant 0 : index
    %0 = vector.load %arg1[%c0, %c0_0] : memref<256x128xbf16, #tpu.memory_space<vmem>>, vector<256x128xbf16>
    %c0_1 = arith.constant 0 : index
    %c0_2 = arith.constant 0 : index
    %1 = vector.load %arg2[%c0_1, %c0_2] : memref<128x128xbf16, #tpu.memory_space<vmem>>, vector<128x128xbf16>
    %cst = arith.constant dense<0.000000e+00> : vector<256x128xf32>
    %2 = tpu.matmul %0, %1, %cst {dimension_numbers = #tpu.dot_dimension_numbers<[1], [0], [0], [1], [0, 0, 1, 1], [], []>} : vector<256x128xbf16>, vector<128x128xbf16>, vector<256x128xf32> -> vector<256x128xf32>
    %c0_3 = arith.constant 0 : index
    %c0_4 = arith.constant 0 : index
    %3 = vector.load %arg3[%c0_3, %c0_4] : memref<1x128xf32, #tpu.memory_space<vmem>>, vector<1x128xf32>
    %4 = vector.broadcast %3 : vector<1x128xf32> to vector<256x128xf32>
    %5 = arith.addf %2, %4 : vector<256x128xf32>
    %cst_5 = arith.constant 0.000000e+00 : f32
    %6 = vector.broadcast %cst_5 : f32 to vector<256x128xf32>
    %7 = arith.maximumf %5, %6 : vector<256x128xf32>
    %8 = arith.truncf %7 : vector<256x128xf32> to vector<256x128xbf16>
    %c0_6 = arith.constant 0 : index
    %c0_7 = arith.constant 0 : index
    %9 = vector.load %arg4[%c0_6, %c0_7] : memref<256x128xbf16, #tpu.memory_space<vmem>>, vector<256x128xbf16>
    tpu.vector_store %arg4[%c0_6, %c0_7], %8 {strides = array<i32>} : memref<256x128xbf16, #tpu.memory_space<vmem>>, vector<256x128xbf16>,
    return
  }
  func.func @transform_0(%arg0: i32) -> (i32, i32) {
    %c0_i32 = arith.constant 0 : i32
    %c0_i32_0 = arith.constant 0 : i32
    return %arg0, %c0_i32 : i32, i32
  }
  func.func @transform_1(%arg0: i32) -> (i32, i32) {
    %c0_i32 = arith.constant 0 : i32
    %c0_i32_0 = arith.constant 0 : i32
    %c0_i32_1 = arith.constant 0 : i32
    return %c0_i32, %c0_i32_0 : i32, i32
  }
  func.func @transform_2(%arg0: i32) -> (i32, i32) {
    %c0_i32 = arith.constant 0 : i32
    %c0_i32_0 = arith.constant 0 : i32
    %c0_i32_1 = arith.constant 0 : i32
    return %c0_i32, %c0_i32_0 : i32, i32
  }
  func.func @transform_3(%arg0: i32) -> (i32, i32) {
    %c0_i32 = arith.constant 0 : i32
    %c0_i32_0 = arith.constant 0 : i32
    return %arg0, %c0_i32 : i32, i32
  }
}

</mosaic_0001>

<bundles_post_ra>
// kernel: tpu_custom_call.1
= control target key start
LH: loop header
LB: loop body
LE: loop exit
PB: predicated region body
PF: predicated region fallthrough
CT: control target
= control target key end

     0   :  { %8 = vsyncpa [#allocation3], 0  ;;  %s1094_s0 = inlined_call_operand.hbm [shape: bf16[256,128], index: 0, kind: input, shape index: {}]   ;;  %s1095_s1 = inlined_call_operand.hbm [shape: bf16[128,128], index: 1, kind: input, shape index: {}]   ;;  %s1096_s2 = inlined_call_operand.vmem [shape: f32[1,128], index: 2, kind: input, shape index: {}]   ;;  %s1097_s3 = inlined_call_operand.hbm [shape: bf16[256,128], index: 3, kind: output, shape index: {}]  }
   0x1   :  { %9 = vsyncpa [#allocation6], 0 }
   0x2   :  { %10 = vsyncpa [#allocation4], 0  ;;  %s987_s12 = smov [#allocation2]   ;;  %s915_s16 = scalar_lea.hbm %s1094_s0, 2048 }
   0x3   :  { %s16_s13 = sshll.u32 %s987_s12, 4  ;;  %p916_p0 = scmp.ne.s32.totalorder %s1094_s0, %s915_s16  ;;  %s17_s13 = int_to_ptr.vmem [resolvable:$true] %s16_s13 }
   0x4   :  { %p919_p1 = scmp.lt.u32.totalorder %s915_s16, %s1094_s0 }
   0x6   :  { %p921_p2 = pnand %p919_p1, %p916_p0 }
   0x8   :  { %924 = shalt.err (!%p921_p2)
}
   0x9   :  { %s925_s21 = scalar_lea.vmem %s17_s13, 2048  ;;  %p930_p4 = scmp.lt.s32.totalorder %s17_s13, %s17_s13 }
   0xa   :  { %p926_p3 = scmp.ne.s32.totalorder %s17_s13, %s925_s21  ;;  %p931_p5 = scmp.lt.s32.totalorder %s925_s21, %s925_s21 }
   0xc   :  { %p932_p6 = por %p931_p5, %p930_p4 }
   0xe   :  { %p933_p7 = pnand %p932_p6, %p926_p3 }
  0x10   :  { %936 = shalt.err (!%p933_p7)
}
  0x11   :  { %s988_s22 = smov 64   ;;  %s989_s23 = smov 4  }
  0x12   :  { %22 = dma.hbm_to_vmem [thread:$0]  %s1094_s0, 2048, %s17_s13, [#allocation3], %s988_s22, %s988_s22, %s989_s23  }
  0x13   :  { %s990_s26 = smov [#allocation5]   ;;  %s937_s30 = scalar_lea.hbm %s1095_s1, 1024 }
  0x14   :  { %s28_s27 = sshll.u32 %s990_s26, 4  ;;  %p938_p8 = scmp.ne.s32.totalorder %s1095_s1, %s937_s30  ;;  %s29_s27 = int_to_ptr.vmem [resolvable:$true] %s28_s27 }
  0x15   :  { %p941_p9 = scmp.lt.u32.totalorder %s937_s30, %s1095_s1 }
  0x17   :  { %p943_p10 = pnand %p941_p9, %p938_p8 }
  0x19   :  { %946 = shalt.err (!%p943_p10)
}
  0x1a   :  { %s947_s8 = scalar_lea.vmem %s29_s27, 1024  ;;  %p952_p12 = scmp.lt.s32.totalorder %s29_s27, %s29_s27 }
  0x1b   :  { %p948_p11 = scmp.ne.s32.totalorder %s29_s27, %s947_s8  ;;  %p953_p13 = scmp.lt.s32.totalorder %s947_s8, %s947_s8 }
  0x1d   :  { %p954_p0 = por %p953_p13, %p952_p12 }
  0x1f   :  { %p955_p1 = pnand %p954_p0, %p948_p11 }
  0x21   :  { %958 = shalt.err (!%p955_p1)
}
  0x22   :  { %34 = dma.hbm_to_vmem [thread:$0]  %s1095_s1, 1024, %s29_s27, [#allocation6], %s988_s22, %s988_s22, %s989_s23  }
  0x23   :  { %981 = dma.done.wait [#allocation3], 2048  }
  0x24   :  { %982 = vsyncadd [#allocation3], 4294965248 }
  0x25   :  { %983 = dma.done.wait [#allocation6], 1024  }
  0x26   :  { %984 = vsyncadd [#allocation6], 4294966272  ;;  %v891_v0 = vld [vmem:[#allocation5] sm:$0xff]   ;;  %v892_v1 = vld [vmem:[#allocation5 + $0x8] sm:$0xff]  }
  0x27   :  { %822 = vmatprep.subr.bf16.mxu0 %v891_v0  ;;  %870 = vmatprep.subr.bf16.mxu1 %v891_v0  ;;  %v893_v2 = vld [vmem:[#allocation5 + $0x10] sm:$0xff]   ;;  %v894_v3 = vld [vmem:[#allocation5 + $0x18] sm:$0xff]   ;;  %v899_v4 = vld [vmem:[#allocation2] sm:$0xff]  }
  0x28   :  { %823 = vmatpush3.bf16.msra.mxu0 %v891_v0  ;;  %878 = vmatpush3.bf16.msra.mxu1 %v891_v0  ;;  %v900_v5 = vld [vmem:[#allocation2 + $0x40] sm:$0xff]   ;;  %v896_v7 = vld [vmem:[#allocation5 + $0x28] sm:$0xff]   ;;  %v897_v8 = vld [vmem:[#allocation5 + $0x30] sm:$0xff]  }
  0x29   :  { %824 = vmatprep.subr.bf16.mxu0 %v892_v1  ;;  %871 = vmatprep.subr.bf16.mxu1 %v892_v1  ;;  %v895_v6 = vld [vmem:[#allocation5 + $0x20] sm:$0xff]   ;;  %v898_v9 = vld [vmem:[#allocation5 + $0x38] sm:$0xff]   ;;  %v901_v10 = vld [vmem:[#allocation2 + $0x8] sm:$0xff]  }
  0x2a   :  { %838 = vmatprep.mubr.bf16.mxu0 %v899_v4  ;;  %854 = vmatprep.mubr.bf16.mxu1 %v900_v5  ;;  %v902_v11 = vld [vmem:[#allocation2 + $0x48] sm:$0xff]   ;;  %v903_v12 = vld [vmem:[#allocation2 + $0x10] sm:$0xff]   ;;  %v905_v14 = vld [vmem:[#allocation2 + $0x18] sm:$0xff]  }
  0x2b   :  { %v904_v13 = vld [vmem:[#allocation2 + $0x50] sm:$0xff]   ;;  %v906_v15 = vld [vmem:[#allocation2 + $0x58] sm:$0xff]   ;;  %v907_v16 = vld [vmem:[#allocation2 + $0x20] sm:$0xff]  }
  0x2c   :  { %825 = vmatpush3.bf16.msra.mxu0 %v892_v1  ;;  %879 = vmatpush3.bf16.msra.mxu1 %v892_v1  ;;  %v908_v17 = vld [vmem:[#allocation2 + $0x60] sm:$0xff]   ;;  %v909_v18 = vld [vmem:[#allocation2 + $0x28] sm:$0xff]   ;;  %v911_v20 = vld [vmem:[#allocation2 + $0x30] sm:$0xff]  }
  0x2d   :  { %826 = vmatprep.subr.bf16.mxu0 %v893_v2  ;;  %872 = vmatprep.subr.bf16.mxu1 %v893_v2  ;;  %v910_v19 = vld [vmem:[#allocation2 + $0x68] sm:$0xff]   ;;  %v912_v21 = vld [vmem:[#allocation2 + $0x70] sm:$0xff]   ;;  %v913_v22 = vld [vmem:[#allocation2 + $0x38] sm:$0xff]  }
  0x2e   :  { %v914_v23 = vld [vmem:[#allocation2 + $0x78] sm:$0xff]   ;;  %v1045_v24 = vld [vmem:[%s1096_s2] ss:$0 sm:$0xff]  ;;  %s991_s2 = smov [#allocation7]  }
  0x2f   :  { %s601_s11 = sshll.u32 %s991_s2, 4  ;;  %s602_s11 = int_to_ptr.vmem [resolvable:$true] %s601_s11 }
  0x30   :  { %827 = vmatpush3.bf16.msra.mxu0 %v893_v2  ;;  %880 = vmatpush3.bf16.msra.mxu1 %v893_v2  ;;  %s959_s12 = scalar_lea.vmem %s602_s11, 2048  ;;  %p964_p3 = scmp.lt.s32.totalorder %s602_s11, %s602_s11 }
  0x31   :  { %828 = vmatprep.subr.bf16.mxu0 %v894_v3  ;;  %873 = vmatprep.subr.bf16.mxu1 %v894_v3  ;;  %p960_p2 = scmp.ne.s32.totalorder %s602_s11, %s959_s12  ;;  %p965_p4 = scmp.lt.s32.totalorder %s959_s12, %s959_s12 }
  0x33   :  { %p966_p5 = por %p965_p4, %p964_p3 }
  0x34   :  { %829 = vmatpush3.bf16.msra.mxu0 %v894_v3  ;;  %881 = vmatpush3.bf16.msra.mxu1 %v894_v3 }
  0x35   :  { %830 = vmatprep.subr.bf16.mxu0 %v895_v6  ;;  %874 = vmatprep.subr.bf16.mxu1 %v895_v6  ;;  %p967_p6 = pnand %p966_p5, %p960_p2 }
  0x38   :  { %831 = vmatpush3.bf16.msra.mxu0 %v895_v6  ;;  %882 = vmatpush3.bf16.msra.mxu1 %v895_v6 }
  0x39   :  { %832 = vmatprep.subr.bf16.mxu0 %v896_v7  ;;  %875 = vmatprep.subr.bf16.mxu1 %v896_v7 }
  0x3c   :  { %833 = vmatpush3.bf16.msra.mxu0 %v896_v7  ;;  %883 = vmatpush3.bf16.msra.mxu1 %v896_v7 }
  0x3d   :  { %834 = vmatprep.subr.bf16.mxu0 %v897_v8  ;;  %876 = vmatprep.subr.bf16.mxu1 %v897_v8 }
  0x40   :  { %835 = vmatpush3.bf16.msra.mxu0 %v897_v8  ;;  %884 = vmatpush3.bf16.msra.mxu1 %v897_v8 }
  0x41   :  { %836 = vmatprep.subr.bf16.mxu0 %v898_v9  ;;  %877 = vmatprep.subr.bf16.mxu1 %v898_v9 }
  0x44   :  { %837 = vmatpush3.bf16.msra.mxu0 %v898_v9  ;;  %885 = vmatpush3.bf16.msra.mxu1 %v898_v9 }
  0x47   :  { %839 = vmatmul.mubr.bf16.vlgmr.msra.gmra.mrb[0].mxu0 %v901_v10  ;;  %855 = vmatmul.mubr.bf16.vlgmr.msra.gmra.mrb[0].mxu1 %v902_v11 }
  0x48   :  { %842 = vmatprep.mubr.bf16.mxu0 %v903_v12  ;;  %858 = vmatprep.mubr.bf16.mxu1 %v904_v13 }
  0x4f   :  { %843 = vmatmul.mubr.bf16.gmra.mrb[4].mxu0 %v905_v14  ;;  %859 = vmatmul.mubr.bf16.gmra.mrb[4].mxu1 %v906_v15 }
  0x50   :  { %846 = vmatprep.mubr.bf16.mxu0 %v907_v16  ;;  %862 = vmatprep.mubr.bf16.mxu1 %v908_v17 }
  0x57   :  { %847 = vmatmul.mubr.bf16.gmra.mrb[8].mxu0 %v909_v18  ;;  %863 = vmatmul.mubr.bf16.gmra.mrb[8].mxu1 %v910_v19 }
  0x58   :  { %850 = vmatprep.mubr.bf16.mxu0 %v911_v20  ;;  %866 = vmatprep.mubr.bf16.mxu1 %v912_v21 }
  0x5f   :  { %851 = vmatmul.mubr.bf16.gmra.mrb[12].mxu0 %v913_v22  ;;  %867 = vmatmul.mubr.bf16.gmra.mrb[12].mxu1 %v914_v23 }
 0x11a   :  { %v840_v25 = vpop.f32.mrb[0].mxu0  ;;  %v856_v26 = vpop.f32.mrb[0].mxu1 }
 0x11b   :  { %v286_v27 = vadd.f32 %v840_v25, %v1045_v24  ;;  %v350_v28 = vadd.f32 %v856_v26, %v1045_v24  ;;  %v277_v29 = vpop.f32.mrb[1].mxu0  ;;  %v341_v30 = vpop.f32.mrb[1].mxu1 }
 0x11c   :  { %v278_v31 = vadd.f32 %v1045_v24, %v277_v29  ;;  %v342_v32 = vadd.f32 %v1045_v24, %v341_v30  ;;  %v841_v33 = vpop.f32.mrb[2].mxu0  ;;  %v857_v34 = vpop.f32.mrb[2].mxu1 }
 0x11d   :  { %v289_v35 = vadd.f32 %v841_v33, %v1045_v24  ;;  %v353_v36 = vadd.f32 %v857_v34, %v1045_v24  ;;  %v280_v37 = vpop.f32.mrb[3].mxu0  ;;  %v344_v38 = vpop.f32.mrb[3].mxu1  ;;  %v406_v41 = vmax.f32 %v286_v27, 0.0  ;;  %v422_v42 = vmax.f32 %v350_v28, 0.0 }
 0x11e   :  { %v281_v39 = vadd.f32 %v1045_v24, %v280_v37  ;;  %v345_v40 = vadd.f32 %v1045_v24, %v344_v38  ;;  %v404_v45 = vmax.f32 %v278_v31, 0.0  ;;  %v420_v46 = vmax.f32 %v342_v32, 0.0 }
 0x11f   :  { %v407_v43 = vmax.f32 %v289_v35, 0.0  ;;  %v423_v44 = vmax.f32 %v353_v36, 0.0 }
 0x120   :  { %v405_v47 = vmax.f32 %v281_v39, 0.0  ;;  %v421_v48 = vmax.f32 %v345_v40, 0.0 }
 0x121   :  { %v711_v49 = vpack.c.bf16 %v407_v43, %v406_v41  ;;  %v751_v50 = vpack.c.bf16 %v423_v44, %v422_v42 }
 0x122   :  { %v706_v51 = vpack.c.bf16 %v405_v47, %v404_v45  ;;  %v746_v52 = vpack.c.bf16 %v421_v48, %v420_v46  ;;  %v844_v53 = vpop.f32.mrb[4].mxu0  ;;  %v860_v54 = vpop.f32.mrb[4].mxu1 }
 0x123   :  { %783 = vst [vmem:[#allocation7 + $0x8] sm:$0xff] %v711_v49   ;;  %791 = vst [vmem:[#allocation7 + $0x48] sm:$0xff] %v751_v50   ;;  %v302_v55 = vadd.f32 %v844_v53, %v1045_v24  ;;  %v366_v56 = vadd.f32 %v860_v54, %v1045_v24  ;;  %v293_v57 = vpop.f32.mrb[5].mxu0  ;;  %v357_v58 = vpop.f32.mrb[5].mxu1 }
 0x124   :  { %707 = vst [vmem:[#allocation7] sm:$0xff] %v706_v51   ;;  %790 = vst [vmem:[#allocation7 + $0x40] sm:$0xff] %v746_v52   ;;  %v294_v59 = vadd.f32 %v1045_v24, %v293_v57  ;;  %v358_v60 = vadd.f32 %v1045_v24, %v357_v58  ;;  %v845_v61 = vpop.f32.mrb[6].mxu0  ;;  %v861_v62 = vpop.f32.mrb[6].mxu1 }
 0x125   :  { %v305_v63 = vadd.f32 %v845_v61, %v1045_v24  ;;  %v369_v0 = vadd.f32 %v861_v62, %v1045_v24  ;;  %v296_v1 = vpop.f32.mrb[7].mxu0  ;;  %v360_v2 = vpop.f32.mrb[7].mxu1  ;;  %v410_v5 = vmax.f32 %v302_v55, 0.0  ;;  %v426_v6 = vmax.f32 %v366_v56, 0.0 }
 0x126   :  { %v297_v3 = vadd.f32 %v1045_v24, %v296_v1  ;;  %v361_v4 = vadd.f32 %v1045_v24, %v360_v2  ;;  %v408_v9 = vmax.f32 %v294_v59, 0.0  ;;  %v424_v10 = vmax.f32 %v358_v60, 0.0 }
 0x127   :  { %v411_v7 = vmax.f32 %v305_v63, 0.0  ;;  %v427_v8 = vmax.f32 %v369_v0, 0.0 }
 0x128   :  { %v409_v11 = vmax.f32 %v297_v3, 0.0  ;;  %v425_v12 = vmax.f32 %v361_v4, 0.0 }
 0x129   :  { %v721_v13 = vpack.c.bf16 %v411_v7, %v410_v5  ;;  %v761_v14 = vpack.c.bf16 %v427_v8, %v426_v6 }
 0x12a   :  { %v716_v15 = vpack.c.bf16 %v409_v11, %v408_v9  ;;  %v756_v16 = vpack.c.bf16 %v425_v12, %v424_v10  ;;  %v848_v17 = vpop.f32.mrb[8].mxu0  ;;  %v864_v18 = vpop.f32.mrb[8].mxu1 }
 0x12b   :  { %785 = vst [vmem:[#allocation7 + $0x18] sm:$0xff] %v721_v13   ;;  %793 = vst [vmem:[#allocation7 + $0x58] sm:$0xff] %v761_v14   ;;  %v318_v19 = vadd.f32 %v848_v17, %v1045_v24  ;;  %v382_v20 = vadd.f32 %v864_v18, %v1045_v24  ;;  %v309_v21 = vpop.f32.mrb[9].mxu0  ;;  %v373_v22 = vpop.f32.mrb[9].mxu1 }
 0x12c   :  { %784 = vst [vmem:[#allocation7 + $0x10] sm:$0xff] %v716_v15   ;;  %792 = vst [vmem:[#allocation7 + $0x50] sm:$0xff] %v756_v16   ;;  %v310_v23 = vadd.f32 %v1045_v24, %v309_v21  ;;  %v374_v25 = vadd.f32 %v1045_v24, %v373_v22  ;;  %v849_v26 = vpop.f32.mrb[10].mxu0  ;;  %v865_v27 = vpop.f32.mrb[10].mxu1 }
 0x12d   :  { %v321_v28 = vadd.f32 %v849_v26, %v1045_v24  ;;  %v385_v29 = vadd.f32 %v865_v27, %v1045_v24  ;;  %v312_v30 = vpop.f32.mrb[11].mxu0  ;;  %v376_v31 = vpop.f32.mrb[11].mxu1  ;;  %v414_v34 = vmax.f32 %v318_v19, 0.0  ;;  %v430_v35 = vmax.f32 %v382_v20, 0.0 }
 0x12e   :  { %v313_v32 = vadd.f32 %v1045_v24, %v312_v30  ;;  %v377_v33 = vadd.f32 %v1045_v24, %v376_v31  ;;  %v412_v38 = vmax.f32 %v310_v23, 0.0  ;;  %v428_v39 = vmax.f32 %v374_v25, 0.0 }
 0x12f   :  { %v415_v36 = vmax.f32 %v321_v28, 0.0  ;;  %v431_v37 = vmax.f32 %v385_v29, 0.0 }
 0x130   :  { %v413_v40 = vmax.f32 %v313_v32, 0.0  ;;  %v429_v41 = vmax.f32 %v377_v33, 0.0 }
 0x131   :  { %v731_v42 = vpack.c.bf16 %v415_v36, %v414_v34  ;;  %v771_v43 = vpack.c.bf16 %v431_v37, %v430_v35 }
 0x132   :  { %v726_v44 = vpack.c.bf16 %v413_v40, %v412_v38  ;;  %v766_v45 = vpack.c.bf16 %v429_v41, %v428_v39  ;;  %v852_v46 = vpop.f32.mrb[12].mxu0  ;;  %v868_v47 = vpop.f32.mrb[12].mxu1 }
 0x133   :  { %787 = vst [vmem:[#allocation7 + $0x28] sm:$0xff] %v731_v42   ;;  %795 = vst [vmem:[#allocation7 + $0x68] sm:$0xff] %v771_v43   ;;  %v334_v48 = vadd.f32 %v852_v46, %v1045_v24  ;;  %v398_v49 = vadd.f32 %v868_v47, %v1045_v24  ;;  %v325_v50 = vpop.f32.mrb[13].mxu0  ;;  %v389_v51 = vpop.f32.mrb[13].mxu1 }
 0x134   :  { %786 = vst [vmem:[#allocation7 + $0x20] sm:$0xff] %v726_v44   ;;  %794 = vst [vmem:[#allocation7 + $0x60] sm:$0xff] %v766_v45   ;;  %v326_v52 = vadd.f32 %v1045_v24, %v325_v50  ;;  %v390_v53 = vadd.f32 %v1045_v24, %v389_v51  ;;  %v853_v54 = vpop.f32.mrb[14].mxu0  ;;  %v869_v55 = vpop.f32.mrb[14].mxu1 }
 0x135   :  { %v337_v56 = vadd.f32 %v853_v54, %v1045_v24  ;;  %v401_v57 = vadd.f32 %v869_v55, %v1045_v24  ;;  %v328_v58 = vpop.f32.mrb[15].mxu0  ;;  %v392_v59 = vpop.f32.mrb[15].mxu1  ;;  %v418_v62 = vmax.f32 %v334_v48, 0.0  ;;  %v434_v63 = vmax.f32 %v398_v49, 0.0 }
 0x136   :  { %v329_v60 = vadd.f32 %v1045_v24, %v328_v58  ;;  %v393_v61 = vadd.f32 %v1045_v24, %v392_v59  ;;  %v416_v2 = vmax.f32 %v326_v52, 0.0  ;;  %v432_v3 = vmax.f32 %v390_v53, 0.0 }
 0x137   :  { %v419_v0 = vmax.f32 %v337_v56, 0.0  ;;  %v435_v1 = vmax.f32 %v401_v57, 0.0 }
 0x138   :  { %v417_v4 = vmax.f32 %v329_v60, 0.0  ;;  %v433_v5 = vmax.f32 %v393_v61, 0.0 }
 0x139   :  { %v741_v6 = vpack.c.bf16 %v419_v0, %v418_v62  ;;  %v781_v7 = vpack.c.bf16 %v435_v1, %v434_v63 }
 0x13a   :  { %v736_v8 = vpack.c.bf16 %v417_v4, %v416_v2  ;;  %v776_v9 = vpack.c.bf16 %v433_v5, %v432_v3 }
 0x13b   :  { %789 = vst [vmem:[#allocation7 + $0x38] sm:$0xff] %v741_v6   ;;  %797 = vst [vmem:[#allocation7 + $0x78] sm:$0xff] %v781_v7  }
 0x13c   :  { %788 = vst [vmem:[#allocation7 + $0x30] sm:$0xff] %v736_v8   ;;  %796 = vst [vmem:[#allocation7 + $0x70] sm:$0xff] %v776_v9  }
 0x13d   :  { %970 = shalt.err (!%p967_p6)
}
 0x13e   :  { %s971_s15 = scalar_lea.hbm %s1097_s3, 2048 }
 0x13f   :  { %p972_p7 = scmp.ne.s32.totalorder %s1097_s3, %s971_s15  ;;  %p975_p8 = scmp.lt.u32.totalorder %s971_s15, %s1097_s3 }
 0x141   :  { %p977_p9 = pnand %p975_p8, %p972_p7 }
 0x143   :  { %980 = shalt.err (!%p977_p9)
}
 0x144   :  { %607 = dma.vmem_to_hbm [thread:$0]  %s602_s11, 2048, %s1097_s3, [#allocation4], %s988_s22, %s988_s22, %s989_s23  }
 0x145   :  { %985 = dma.done.wait [#allocation4], 2048  }
 0x146   :  { %986 = vsyncadd [#allocation4], 4294965248 }
 0x147   :  { %611 = vsyncpa [#allocation3], 1 }
 0x148   :  { %612 = vsyncpa [#allocation6], 1 }
 0x149   :  { %613 = vsyncpa [#allocation4], 1 }

</bundles_post_ra>
